<compile_context>
chip_gen: v7x
topology: tpu7x:2x2x1
jax: 0.10.0
libtpu: 0.0.40
codegen_flags: <defaults>
</compile_context>

<pallas_src>
import functools

import numpy as np
import jax
import jax.numpy as jnp
from jax import lax
from jax.experimental import pallas as pl
from jax.experimental.pallas import tpu as pltpu

# ----------------------------- model config (small stand-in) -----------------------------
N_EVENTS = 16                      # module-level constant used in forward()
LATENT_DIM = 16
CHANNELS = 128                     # LinearOutputStack hidden width (lane-dense)
N_SAMPLES = 4096                   # small stand-in for the module's 32768
N_FRAMES = N_SAMPLES // 128        # to_envelope out_channels = n_samples // 128 = 32
FILTER_SIZE = 64                   # fixed in __init__
HEAD_W = 128                       # env(32) + filt(64) heads packed into one 128-lane slab
BLOCK_N = 32                       # rows per grid step
CARRY = 128                        # FIR history carried between chunks (>= FILTER_SIZE, aligned)
CONV_CHUNK = 1024                  # time chunk for upsample + FIR
EXT_W = CARRY + CONV_CHUNK
# n_filter_bands / encoding_channels are stored by __init__ but unused in forward().

assert N_FRAMES + FILTER_SIZE <= HEAD_W
assert FILTER_SIZE <= CARRY <= CONV_CHUNK
assert N_SAMPLES % CONV_CHUNK == 0 and CONV_CHUNK % 128 == 0 and CARRY % 128 == 0


# ----------------------------- shared math (kernel + reference) -----------------------------
def _layer_norm(h, g, b):
    mu = jnp.mean(h, axis=-1, keepdims=True)
    d = h - mu
    var = jnp.mean(d * d, axis=-1, keepdims=True)
    return d * lax.rsqrt(var + 1e-5) * g + b


def _mlp_heads(x_bf16, w_in, b_in, w_hid, b_hid, ln_g, ln_b, w_head, b_head):
    """to_envelope / to_filt LinearOutputStacks; works on Refs (kernel) or arrays (ref)."""
    f32 = jnp.float32
    bf16 = jnp.bfloat16
    # both stacks' first Linears fused into one (N,16)@(16,256) bf16 dot, f32 accumulate
    h0 = jnp.dot(x_bf16, w_in[...], preferred_element_type=f32) + b_in[...]
    heads = []
    for s in range(2):                                  # 0: to_envelope, 1: to_filt
        h = h0[:, s * CHANNELS:(s + 1) * CHANNELS]
        h = _layer_norm(h, ln_g[s, 0], ln_b[s, 0])
        h = jax.nn.leaky_relu(h, negative_slope=0.2)
        for l in range(2):
            h = jnp.dot(h.astype(bf16), w_hid[s, l],
                        preferred_element_type=f32) + b_hid[s, l]
            h = _layer_norm(h, ln_g[s, l + 1], ln_b[s, l + 1])
            h = jax.nn.leaky_relu(h, negative_slope=0.2)
        heads.append(h.astype(bf16))
    # both output heads in one lane-dense (N, 128) slab: [0:32) env frames, [32:96) taps
    y = (jnp.dot(heads[0], w_head[0], preferred_element_type=f32)
         + jnp.dot(heads[1], w_head[1], preferred_element_type=f32)
         + b_head[...])
    env_fr = y[:, :N_FRAMES].astype(bf16)               # (N, n_frames) for interp matmul
    filt = y[:, N_FRAMES:N_FRAMES + FILTER_SIZE]        # (N, filter_size) f32
    return env_fr, filt


# ----------------------------- fused Pallas kernel -----------------------------
def _fused_kernel(x_ref, noise_ref, interp_ref,
                  w_in_ref, b_in_ref, w_hid_ref, b_hid_ref,
                  ln_g_ref, ln_b_ref, w_head_ref, b_head_ref,
                  o_ref, *, np_roll):
    f32 = jnp.float32
    bf16 = jnp.bfloat16

    # ---- to_envelope / to_filt stacks (bf16 MXU, f32 accum) ----
    env_fr, filt = _mlp_heads(x_ref[...].astype(bf16),
                              w_in_ref, b_in_ref, w_hid_ref, b_hid_ref,
                              ln_g_ref, ln_b_ref, w_head_ref, b_head_ref)
    # hoisted per-tap columns (one extraction per tap per grid step)
    filt_cols = [filt[:, k:k + 1] for k in range(FILTER_SIZE)]

    # ---- time-chunked: interp-upsample -> relu -> * noise -> 64-tap causal FIR ----
    carry = jnp.zeros((BLOCK_N, CARRY), f32)            # zero history (linear convolution)
    for c0 in range(0, N_SAMPLES, CONV_CHUNK):
        # F.interpolate(mode='linear') for this time chunk as a (frames x chunk) matmul
        env = jnp.dot(env_fr, interp_ref[:, c0:c0 + CONV_CHUNK],
                      preferred_element_type=f32)        # (BLOCK_N, CONV_CHUNK)
        sig = jnp.maximum(env, 0.0) * noise_ref[:, c0:c0 + CONV_CHUNK]

        # FIR: shifted segments produced in-register from one aligned [carry|chunk] window
        ext = jnp.concatenate([carry, sig], axis=1)      # (BLOCK_N, EXT_W), lane-aligned
        acc = sig * filt_cols[0]                         # tap 0 needs no shift
        for k in range(1, FILTER_SIZE):
            shift = k if np_roll else EXT_W - k          # robust to rotate convention
            seg = pltpu.roll(ext, shift, axis=1)[:, CARRY:]   # == sig[t - k]
            acc = acc + seg * filt_cols[k]
        o_ref[:, c0:c0 + CONV_CHUNK] = acc               # lane-dense aligned store
        carry = sig[:, CONV_CHUNK - CARRY:]              # history for the next chunk


# ----------------------------- roll convention probe -----------------------------
def _roll_probe_kernel(x_ref, o_ref):
    o_ref[...] = pltpu.roll(x_ref[...], 1, axis=1)


def _detect_np_roll_convention():
    """True iff pltpu.roll matches np.roll (element i -> i + shift)."""
    x = lax.broadcasted_iota(jnp.float32, (8, 256), 1)
    y = pl.pallas_call(
        _roll_probe_kernel,
        out_shape=jax.ShapeDtypeStruct((8, 256), jnp.float32),
    )(x)
    return bool(y[0, 0] == 255.0)


# ----------------------------- wrapper -----------------------------
def simple_generate_impulse(params, x, noise, interp_bf16, *, np_roll):
    """x: (B, n_events, latent_dim); noise: (B, n_events, n_samples) uniform(-1,1)."""
    b, ne, _ = x.shape
    n = b * ne
    assert n % BLOCK_N == 0
    x2d = x.reshape(n, LATENT_DIM)
    noise2d = noise.reshape(n, N_SAMPLES)

    bf16 = jnp.bfloat16
    w_in = params['w_in'].astype(bf16)
    w_hid = params['w_hid'].astype(bf16)
    w_head = params['w_head'].astype(bf16)

    kernel = functools.partial(_fused_kernel, np_roll=np_roll)

    out = pl.pallas_call(
        kernel,
        out_shape=jax.ShapeDtypeStruct((n, N_SAMPLES), jnp.float32),
        grid=(n // BLOCK_N,),
        in_specs=[
            pl.BlockSpec((BLOCK_N, LATENT_DIM), lambda i: (i, 0)),
            pl.BlockSpec((BLOCK_N, N_SAMPLES), lambda i: (i, 0)),
            pl.BlockSpec((N_FRAMES, N_SAMPLES), lambda i: (0, 0)),
            pl.BlockSpec((LATENT_DIM, 2 * CHANNELS), lambda i: (0, 0)),
            pl.BlockSpec((1, 2 * CHANNELS), lambda i: (0, 0)),
            pl.BlockSpec((2, 2, CHANNELS, CHANNELS), lambda i: (0, 0, 0, 0)),
            pl.BlockSpec((2, 2, 1, CHANNELS), lambda i: (0, 0, 0, 0)),
            pl.BlockSpec((2, 3, 1, CHANNELS), lambda i: (0, 0, 0, 0)),
            pl.BlockSpec((2, 3, 1, CHANNELS), lambda i: (0, 0, 0, 0)),
            pl.BlockSpec((2, CHANNELS, HEAD_W), lambda i: (0, 0, 0)),
            pl.BlockSpec((1, HEAD_W), lambda i: (0, 0)),
        ],
        out_specs=pl.BlockSpec((BLOCK_N, N_SAMPLES), lambda i: (i, 0)),
        compiler_params=pltpu.CompilerParams(
            dimension_semantics=("parallel",),
            vmem_limit_bytes=32 * 1024 * 1024),
    )(x2d, noise2d, interp_bf16,
      w_in, params['b_in'], w_hid, params['b_hid'],
      params['ln_g'], params['ln_b'], w_head, params['b_head'])
    return out.reshape(b, ne, N_SAMPLES)


# ----------------------------- pure-JAX reference (same numerics) -----------------------------
def reference_forward(params, x, noise, interp_bf16):
    f32 = jnp.float32
    bf16 = jnp.bfloat16
    b, ne, _ = x.shape
    n = b * ne
    x2 = x.reshape(n, LATENT_DIM).astype(bf16)
    noise2 = noise.reshape(n, N_SAMPLES)
    env_fr, filt = _mlp_heads(x2,
                              params['w_in'].astype(bf16), params['b_in'],
                              params['w_hid'].astype(bf16), params['b_hid'],
                              params['ln_g'], params['ln_b'],
                              params['w_head'].astype(bf16), params['b_head'])
    env_up = jnp.maximum(jnp.dot(env_fr, interp_bf16, preferred_element_type=f32), 0.0)
    sig = env_up * noise2
    padded = jnp.pad(sig, ((0, 0), (FILTER_SIZE - 1, 0)))
    out = jnp.zeros_like(sig)
    for k in range(FILTER_SIZE):
        out = out + filt[:, k:k + 1] * padded[:, FILTER_SIZE - 1 - k:
                                              FILTER_SIZE - 1 - k + N_SAMPLES]
    return out.reshape(b, ne, N_SAMPLES)


# ----------------------------- constants & params (glue) -----------------------------
def build_interp_matrix(in_len, out_len):
    """F.interpolate(mode='linear', align_corners=False) as an (in, out) matmul."""
    m = np.zeros((in_len, out_len), dtype=np.float32)
    scale = in_len / out_len
    for i in range(out_len):
        src = max((i + 0.5) * scale - 0.5, 0.0)
        i0 = min(int(np.floor(src)), in_len - 1)
        i1 = min(i0 + 1, in_len - 1)
        w = src - i0
        m[i0, i] += 1.0 - w
        m[i1, i] += w
    return jnp.asarray(m)


def init_params(key):
    ks = jax.random.split(key, 4)

    def w(k, shape, scale):
        return jax.random.normal(k, shape, dtype=jnp.float32) * scale

    C = CHANNELS
    p = {}
    # first Linears of both stacks, concatenated along Dout: [env | filt]
    p['w_in'] = w(ks[0], (LATENT_DIM, 2 * C), 0.25)
    p['b_in'] = jnp.zeros((1, 2 * C), jnp.float32)
    # two hidden Linear(C,C) per stack: (stack, layer, C, C)
    p['w_hid'] = w(ks[1], (2, 2, C, C), 0.09)
    p['b_hid'] = jnp.zeros((2, 2, 1, C), jnp.float32)
    # LayerNorm((channels,)) params per (stack, layer)
    p['ln_g'] = jnp.ones((2, 3, 1, C), jnp.float32)
    p['ln_b'] = jnp.zeros((2, 3, 1, C), jnp.float32)
    # output heads packed into disjoint 128-lane column ranges
    w_head = np.zeros((2, C, HEAD_W), dtype=np.float32)
    w_head[0, :, :N_FRAMES] = np.asarray(w(ks[2], (C, N_FRAMES), 0.09))
    w_head[1, :, N_FRAMES:N_FRAMES + FILTER_SIZE] = np.asarray(
        w(ks[3], (C, FILTER_SIZE), 0.09))
    p['w_head'] = jnp.asarray(w_head)
    p['b_head'] = jnp.zeros((1, HEAD_W), jnp.float32)
    return p


# ----------------------------- main -----------------------------
if __name__ == "__main__":
    key = jax.random.PRNGKey(0)
    kp, kx, kn = jax.random.split(key, 3)
    params = init_params(kp)

    B = 4                                   # B * n_events = 64 -> 2 "parallel" row blocks
    x = jax.random.normal(kx, (B, N_EVENTS, LATENT_DIM), dtype=jnp.float32)
    # deterministic stand-in for torch.zeros(...).uniform_(-1, 1)
    noise = jax.random.uniform(kn, (B, N_EVENTS, N_SAMPLES),
                               minval=-1.0, maxval=1.0, dtype=jnp.float32)
    interp_bf16 = build_interp_matrix(N_FRAMES, N_SAMPLES).astype(jnp.bfloat16)

    np_roll = _detect_np_roll_convention()

    fwd = jax.jit(functools.partial(simple_generate_impulse, params, np_roll=np_roll))
    out = jax.block_until_ready(fwd(x, noise, interp_bf16))

    assert out.shape == (B, N_EVENTS, N_SAMPLES), out.shape
    assert bool(jnp.all(jnp.isfinite(out)))

    # numeric check against a pure-JAX reference with identical numerics
    ref = jax.block_until_ready(
        jax.jit(functools.partial(reference_forward, params))(x, noise, interp_bf16))
    rel_err = float(jnp.max(jnp.abs(out - ref)) / (jnp.max(jnp.abs(ref)) + 1e-6))
    assert rel_err < 5e-2, f"kernel/reference mismatch, rel_err={rel_err}"

    print("KERNEL_OK")
</pallas_src>

<mosaic_0001>
module attributes {stable_mosaic.version = 11 : i64} {
  func.func @_roll_probe_kernel(%arg0: memref<8x256xf32, #tpu.memory_space<vmem>>, %arg1: memref<8x256xf32, #tpu.memory_space<vmem>>) attributes {dimension_semantics = [], scalar_prefetch = 0 : i64, scratch_operands = 0 : i64, tpu.core_type = #tpu.core_type<tc>} {
    %c0 = arith.constant 0 : index
    %c0_0 = arith.constant 0 : index
    %0 = vector.load %arg0[%c0, %c0_0] : memref<8x256xf32, #tpu.memory_space<vmem>>, vector<8x256xf32>
    %c1_i32 = arith.constant 1 : i32
    %1 = tpu.dynamic_rotate %0 by %c1_i32 dim 1 : vector<8x256xf32>, i32 -> vector<8x256xf32>
    %c0_1 = arith.constant 0 : index
    %c0_2 = arith.constant 0 : index
    %2 = vector.load %arg1[%c0_1, %c0_2] : memref<8x256xf32, #tpu.memory_space<vmem>>, vector<8x256xf32>
    tpu.vector_store %arg1[%c0_1, %c0_2], %1 {strides = array<i32>} : memref<8x256xf32, #tpu.memory_space<vmem>>, vector<8x256xf32>,
    return
  }
}

</mosaic_0001>

<bundles_post_ra>
// kernel: tpu_custom_call.1
= control target key start
LH: loop header
LB: loop body
LE: loop exit
PB: predicated region body
PF: predicated region fallthrough
CT: control target
= control target key end

     0   :  { %6 = vsyncpa [#allocation3], 0  ;;  %s137_s0 = inlined_call_operand.hbm [shape: f32[8,256], index: 0, kind: input, shape index: {}]   ;;  %s138_s1 = inlined_call_operand.hbm [shape: f32[8,256], index: 1, kind: output, shape index: {}]  }
   0x1   :  { %7 = vsyncpa [#allocation4], 0  ;;  %s100_s6 = smov [#allocation2]   ;;  %s52_s10 = scalar_lea.hbm %s137_s0, 256 }
   0x2   :  { %s14_s7 = sshll.u32 %s100_s6, 4  ;;  %p53_p0 = scmp.ne.s32.totalorder %s137_s0, %s52_s10  ;;  %s15_s7 = int_to_ptr.vmem [resolvable:$true] %s14_s7 }
   0x3   :  { %p56_p1 = scmp.lt.u32.totalorder %s52_s10, %s137_s0 }
   0x5   :  { %p58_p2 = pnand %p56_p1, %p53_p0 }
   0x7   :  { %61 = shalt.err (!%p58_p2)
}
   0x8   :  { %s62_s15 = scalar_lea.vmem %s15_s7, 256  ;;  %p67_p4 = scmp.lt.s32.totalorder %s15_s7, %s15_s7 }
   0x9   :  { %p63_p3 = scmp.ne.s32.totalorder %s15_s7, %s62_s15  ;;  %p68_p5 = scmp.lt.s32.totalorder %s62_s15, %s62_s15 }
   0xb   :  { %p69_p6 = por %p68_p5, %p67_p4 }
   0xd   :  { %p70_p7 = pnand %p69_p6, %p63_p3 }
   0xf   :  { %73 = shalt.err (!%p70_p7)
}
  0x10   :  { %17 = dma.hbm_to_vmem [thread:$0]  %s137_s0, 256, %s15_s7, [#allocation3]  }
  0x11   :  { %96 = dma.done.wait [#allocation3], 256  }
  0x12   :  { %97 = vsyncadd [#allocation3], 4294967040  ;;  %v21_v0 = vld [vmem:[#allocation2] sm:$0xff]  ;;  %s101_s18 = smov 1   ;;  %v22_v1 = vld [vmem:[#allocation2 + $0x8] sm:$0xff]  ;;  %v27_v2 = vlaneseq  ;;  %s102_s19 = smov [#allocation5]  }
  0x13   :  { %23 = vrot.lane.b32.xlu0 %v21_v0, %s101_s18  ;;  %s40_s20 = sshll.u32 %s102_s19, 4  ;;  %s41_s20 = int_to_ptr.vmem [resolvable:$true] %s40_s20 }
  0x14   :  { %v28_v3 = vand.u32 127, %v27_v2  ;;  %s74_s0 = scalar_lea.vmem %s41_s20, 256  ;;  %p79_p9 = scmp.lt.s32.totalorder %s41_s20, %s41_s20 }
  0x15   :  { %p75_p8 = scmp.ne.s32.totalorder %s41_s20, %s74_s0  ;;  %p80_p10 = scmp.lt.s32.totalorder %s74_s0, %s74_s0 }
  0x16   :  { %vm29_vm0 = vcmp.lt.s32.totalorder %v28_v3, 1 }
  0x17   :  { %25 = vrot.lane.b32.xlu0 %v22_v1, %s101_s18  ;;  %p81_p11 = por %p80_p10, %p79_p9 }
  0x19   :  { %p82_p12 = pnand %p81_p11, %p75_p8 }
  0x85   :  { %v24_v4 = vpop.permute.xlu0 %23 }
  0x89   :  { %v26_v5 = vpop.permute.xlu0 %25 }
  0x8a   :  { %v30_v6 = vsel %vm29_vm0, %v24_v4, %v26_v5  ;;  %v31_v7 = vsel %vm29_vm0, %v26_v5, %v24_v4 }
  0x8b   :  { %32 = vst [vmem:[#allocation5] sm:$0xff] %v31_v7  ;;  %33 = vst [vmem:[#allocation5 + $0x8] sm:$0xff] %v30_v6 }
  0x8c   :  { %85 = shalt.err (!%p82_p12)
}
  0x8d   :  { %s86_s23 = scalar_lea.hbm %s138_s1, 256 }
  0x8e   :  { %p87_p13 = scmp.ne.s32.totalorder %s138_s1, %s86_s23  ;;  %p90_p0 = scmp.lt.u32.totalorder %s86_s23, %s138_s1 }
  0x90   :  { %p92_p1 = pnand %p90_p0, %p87_p13 }
  0x92   :  { %95 = shalt.err (!%p92_p1)
}
  0x93   :  { %43 = dma.vmem_to_hbm [thread:$0]  %s41_s20, 256, %s138_s1, [#allocation4]  }
  0x94   :  { %98 = dma.done.wait [#allocation4], 256  }
  0x95   :  { %99 = vsyncadd [#allocation4], 4294967040 }
  0x96   :  { %47 = vsyncpa [#allocation3], 1 }
  0x97   :  { %48 = vsyncpa [#allocation4], 1 }

</bundles_post_ra>
